<compile_context>
chip_gen: v6e
topology: v6e:2x2x1
jax: 0.10.0
libtpu: 0.0.40
codegen_flags: <defaults>
</compile_context>

<pallas_src>
import jax
import jax.numpy as jnp
from jax.experimental import pallas as pl
from jax.experimental.pallas import tpu as pltpu


# Batch tile. bf16 x block is TILE_B * 128 (lane-padded) * 2 B ~= 0.5 MiB per
# buffer at 2048 rows -> fits v7x's 32 MiB default scoped VMEM comfortably
# (double-buffered), and is >512 rows so it stays near the HBM roofline on
# v5e/v6e as well.
_TILE_B = 2048


def _round_up(n, m):
    return ((n + m - 1) // m) * m


def _mlp_kernel(x_ref, w1_ref, b1_ref, w2_ref, b2_ref, w3_ref, b3_ref, o_ref):
    # Layer 1: bf16 MXU matmul, f32 accumulation, f32 epilogue (v5e-safe).
    h1 = jnp.dot(x_ref[...], w1_ref[...], preferred_element_type=jnp.float32)
    h1 = jnp.maximum(h1 + b1_ref[...], 0.0)
    # Layer 2: same.
    h2 = jnp.dot(h1.astype(jnp.bfloat16), w2_ref[...],
                 preferred_element_type=jnp.float32)
    h2 = jnp.maximum(h2 + b2_ref[...], 0.0)
    # Layer 3 (64 -> 1): an N=1 matmul wastes the MXU / result FIFO, so do a
    # VPU multiply + lane reduction; b3 folded in as an SMEM scalar.
    logits = jnp.sum(h2 * w3_ref[...], axis=-1, keepdims=True) + b3_ref[0, 0]
    o_ref[...] = jax.nn.sigmoid(logits).astype(o_ref.dtype)


def fraud_detection_forward(x, params, tile_b=None):
    """Fused forward pass. x: (B, input_dim) float32 -> (B, 1) float32."""
    w1, b1, w2, b2, w3, b3 = params
    B, D = x.shape

    if tile_b is None:
        tile_b = min(_TILE_B, _round_up(B, 8))
    b_pad = _round_up(B, tile_b)
    if b_pad != B:
        x = jnp.pad(x, ((0, b_pad - B), (0, 0)))

    # bf16 operands for the MXU matmuls; layer-3 weights / biases stay f32
    # since they only feed the f32 VPU epilogue.
    x_bf16 = x.astype(jnp.bfloat16)
    w1_bf16 = w1.astype(jnp.bfloat16)
    w2_bf16 = w2.astype(jnp.bfloat16)
    w3_row = jnp.reshape(w3, (1, -1)).astype(jnp.float32)   # (1, 64)
    b3_s = jnp.reshape(b3, (1, 1)).astype(jnp.float32)      # SMEM scalar

    grid = (b_pad // tile_b,)

    def resident(shape):
        # Constant block index for every grid step -> Pallas keeps the block
        # VMEM-resident and skips the re-DMA.
        return pl.BlockSpec(shape, lambda i: tuple(0 for _ in shape))

    flops = 2 * b_pad * (D * 128 + 128 * 64 + 64)
    bytes_accessed = (
        x_bf16.size * 2 + w1_bf16.size * 2 + w2_bf16.size * 2
        + (b1.size + b2.size + w3_row.size + b3_s.size) * 4
        + b_pad * 4)

    out = pl.pallas_call(
        _mlp_kernel,
        out_shape=jax.ShapeDtypeStruct((b_pad, 1), jnp.float32),
        grid=grid,
        in_specs=[
            pl.BlockSpec((tile_b, D), lambda i: (i, 0)),      # x: batch-tiled
            resident(w1_bf16.shape), resident(b1.shape),
            resident(w2_bf16.shape), resident(b2.shape),
            resident(w3_row.shape),
            pl.BlockSpec(memory_space=pltpu.MemorySpace.SMEM),  # b3 scalar
        ],
        out_specs=pl.BlockSpec((tile_b, 1), lambda i: (i, 0)),
        compiler_params=pltpu.CompilerParams(
            dimension_semantics=("parallel",)),
        cost_estimate=pl.CostEstimate(
            flops=flops, transcendentals=b_pad, bytes_accessed=bytes_accessed),
    )(x_bf16, w1_bf16, b1, w2_bf16, b2, w3_row, b3_s)

    return out[:B]


def init_params(key, input_dim):
    """Mirror nn.Linear default init (uniform +/- 1/sqrt(fan_in)).
    Weights stored as (in, out); biases as (1, out)."""
    def linear(k, fan_in, fan_out):
        kw, kb = jax.random.split(k)
        bound = 1.0 / jnp.sqrt(jnp.float32(fan_in))
        w = jax.random.uniform(kw, (fan_in, fan_out), jnp.float32, -bound, bound)
        b = jax.random.uniform(kb, (1, fan_out), jnp.float32, -bound, bound)
        return w, b

    k1, k2, k3 = jax.random.split(key, 3)
    w1, b1 = linear(k1, input_dim, 128)
    w2, b2 = linear(k2, 128, 64)
    w3, b3 = linear(k3, 64, 1)
    return w1, b1, w2, b2, w3, b3


def reference_forward(x, params):
    """Pure-JAX f32 reference."""
    w1, b1, w2, b2, w3, b3 = params
    h1 = jnp.maximum(x @ w1 + b1, 0.0)
    h2 = jnp.maximum(h1 @ w2 + b2, 0.0)
    return jax.nn.sigmoid(h2 @ w3 + b3)


if __name__ == "__main__":
    key = jax.random.PRNGKey(0)
    k_params, k_x = jax.random.split(key)

    batch = 8
    input_dim = 32  # stand-in for X_train.shape[1]

    params = init_params(k_params, input_dim)
    x = jax.random.normal(k_x, (batch, input_dim), jnp.float32)

    # Single-tile path (small demo batch).
    out = jax.block_until_ready(fraud_detection_forward(x, params))
    ref = reference_forward(x, params)
    assert out.shape == (batch, 1), out.shape
    # bf16 matmul operands -> compare to the f32 reference with a loose tol.
    assert jnp.allclose(out, ref, atol=2e-2, rtol=2e-2), "mismatch vs reference"

    # Multi-tile + remainder path (forces grid=3 with 8 padded rows).
    x2 = jax.random.normal(jax.random.PRNGKey(1), (40, input_dim), jnp.float32)
    out2 = jax.block_until_ready(fraud_detection_forward(x2, params, tile_b=16))
    ref2 = reference_forward(x2, params)
    assert out2.shape == (40, 1), out2.shape
    assert jnp.allclose(out2, ref2, atol=2e-2, rtol=2e-2), "mismatch (tiled)"

    print("KERNEL_OK")
</pallas_src>

<mosaic_0001>
module attributes {stable_mosaic.version = 11 : i64} {
  func.func @_mlp_kernel(%arg0: i32, %arg1: memref<8x32xbf16, #tpu.memory_space<vmem>>, %arg2: memref<32x128xbf16, #tpu.memory_space<vmem>>, %arg3: memref<1x128xf32, #tpu.memory_space<vmem>>, %arg4: memref<128x64xbf16, #tpu.memory_space<vmem>>, %arg5: memref<1x64xf32, #tpu.memory_space<vmem>>, %arg6: memref<1x64xf32, #tpu.memory_space<vmem>>, %arg7: memref<1x1xf32, #tpu.memory_space<smem>>, %arg8: memref<8x1xf32, #tpu.memory_space<vmem>>) attributes {dimension_semantics = [#tpu.dimension_semantics<parallel>], iteration_bounds = array<i64: 1>, scalar_prefetch = 0 : i64, scratch_operands = 0 : i64, tpu.core_type = #tpu.core_type<tc>, window_params = [{transform_indices = @transform_0, window_bounds = array<i64: 8, 32>}, {pipeline_mode = #tpu.pipeline_mode<synchronous>, transform_indices = @transform_1, window_bounds = array<i64: 32, 128>}, {pipeline_mode = #tpu.pipeline_mode<synchronous>, transform_indices = @transform_2, window_bounds = array<i64: 1, 128>}, {pipeline_mode = #tpu.pipeline_mode<synchronous>, transform_indices = @transform_3, window_bounds = array<i64: 128, 64>}, {pipeline_mode = #tpu.pipeline_mode<synchronous>, transform_indices = @transform_4, window_bounds = array<i64: 1, 64>}, {pipeline_mode = #tpu.pipeline_mode<synchronous>, transform_indices = @transform_5, window_bounds = array<i64: 1, 64>}, {transform_indices = @transform_6, window_bounds = array<i64: 1, 1>}, {transform_indices = @transform_7, window_bounds = array<i64: 8, 1>}]} {
    %c0 = arith.constant 0 : index
    %c0_0 = arith.constant 0 : index
    %0 = vector.load %arg1[%c0, %c0_0] : memref<8x32xbf16, #tpu.memory_space<vmem>>, vector<8x32xbf16>
    %c0_1 = arith.constant 0 : index
    %c0_2 = arith.constant 0 : index
    %1 = vector.load %arg2[%c0_1, %c0_2] : memref<32x128xbf16, #tpu.memory_space<vmem>>, vector<32x128xbf16>
    %cst = arith.constant dense<0.000000e+00> : vector<8x128xf32>
    %2 = tpu.matmul %0, %1, %cst {dimension_numbers = #tpu.dot_dimension_numbers<[1], [0], [0], [1], [0, 0, 1, 1], [], []>} : vector<8x32xbf16>, vector<32x128xbf16>, vector<8x128xf32> -> vector<8x128xf32>
    %c0_3 = arith.constant 0 : index
    %c0_4 = arith.constant 0 : index
    %3 = vector.load %arg3[%c0_3, %c0_4] : memref<1x128xf32, #tpu.memory_space<vmem>>, vector<1x128xf32>
    %4 = vector.broadcast %3 : vector<1x128xf32> to vector<8x128xf32>
    %5 = arith.addf %2, %4 : vector<8x128xf32>
    %cst_5 = arith.constant 0.000000e+00 : f32
    %6 = vector.broadcast %cst_5 : f32 to vector<8x128xf32>
    %7 = arith.maximumf %5, %6 : vector<8x128xf32>
    %8 = arith.truncf %7 : vector<8x128xf32> to vector<8x128xbf16>
    %c0_6 = arith.constant 0 : index
    %c0_7 = arith.constant 0 : index
    %9 = vector.load %arg4[%c0_6, %c0_7] : memref<128x64xbf16, #tpu.memory_space<vmem>>, vector<128x64xbf16>
    %cst_8 = arith.constant dense<0.000000e+00> : vector<8x64xf32>
    %10 = tpu.matmul %8, %9, %cst_8 {dimension_numbers = #tpu.dot_dimension_numbers<[1], [0], [0], [1], [0, 0, 1, 1], [], []>} : vector<8x128xbf16>, vector<128x64xbf16>, vector<8x64xf32> -> vector<8x64xf32>
    %c0_9 = arith.constant 0 : index
    %c0_10 = arith.constant 0 : index
    %11 = vector.load %arg5[%c0_9, %c0_10] : memref<1x64xf32, #tpu.memory_space<vmem>>, vector<1x64xf32>
    %12 = vector.broadcast %11 : vector<1x64xf32> to vector<8x64xf32>
    %13 = arith.addf %10, %12 : vector<8x64xf32>
    %cst_11 = arith.constant 0.000000e+00 : f32
    %14 = vector.broadcast %cst_11 : f32 to vector<8x64xf32>
    %15 = arith.maximumf %13, %14 : vector<8x64xf32>
    %c0_12 = arith.constant 0 : index
    %c0_13 = arith.constant 0 : index
    %16 = vector.load %arg6[%c0_12, %c0_13] : memref<1x64xf32, #tpu.memory_space<vmem>>, vector<1x64xf32>
    %17 = vector.broadcast %16 : vector<1x64xf32> to vector<8x64xf32>
    %18 = arith.mulf %15, %17 : vector<8x64xf32>
    %cst_14 = arith.constant dense<0.000000e+00> : vector<8xf32>
    %19 = vector.multi_reduction <add>, %18, %cst_14 [1] : vector<8x64xf32> to vector<8xf32>
    %20 = vector.shape_cast %19 : vector<8xf32> to vector<8x1xf32>
    %c0_15 = arith.constant 0 : index
    %c0_16 = arith.constant 0 : index
    %21 = memref.load %arg7[%c0_15, %c0_16] : memref<1x1xf32, #tpu.memory_space<smem>>
    %22 = vector.broadcast %21 : f32 to vector<8x1xf32>
    %23 = arith.addf %20, %22 : vector<8x1xf32>
    %24 = arith.negf %23 : vector<8x1xf32>
    %25 = math.exp %24 : vector<8x1xf32>
    %cst_17 = arith.constant 1.000000e+00 : f32
    %26 = vector.broadcast %cst_17 : f32 to vector<8x1xf32>
    %27 = arith.addf %26, %25 : vector<8x1xf32>
    %28 = arith.divf %26, %27 : vector<8x1xf32>
    %c0_18 = arith.constant 0 : index
    %c0_19 = arith.constant 0 : index
    %29 = vector.load %arg8[%c0_18, %c0_19] : memref<8x1xf32, #tpu.memory_space<vmem>>, vector<8x1xf32>
    tpu.vector_store %arg8[%c0_18, %c0_19], %28 {strides = array<i32>} : memref<8x1xf32, #tpu.memory_space<vmem>>, vector<8x1xf32>,
    return
  }
  func.func @transform_0(%arg0: i32) -> (i32, i32) {
    %c0_i32 = arith.constant 0 : i32
    %c0_i32_0 = arith.constant 0 : i32
    return %arg0, %c0_i32 : i32, i32
  }
  func.func @transform_1(%arg0: i32) -> (i32, i32) {
    %c0_i32 = arith.constant 0 : i32
    %c0_i32_0 = arith.constant 0 : i32
    %c0_i32_1 = arith.constant 0 : i32
    return %c0_i32, %c0_i32_0 : i32, i32
  }
  func.func @transform_2(%arg0: i32) -> (i32, i32) {
    %c0_i32 = arith.constant 0 : i32
    %c0_i32_0 = arith.constant 0 : i32
    %c0_i32_1 = arith.constant 0 : i32
    return %c0_i32, %c0_i32_0 : i32, i32
  }
  func.func @transform_3(%arg0: i32) -> (i32, i32) {
    %c0_i32 = arith.constant 0 : i32
    %c0_i32_0 = arith.constant 0 : i32
    %c0_i32_1 = arith.constant 0 : i32
    return %c0_i32, %c0_i32_0 : i32, i32
  }
  func.func @transform_4(%arg0: i32) -> (i32, i32) {
    %c0_i32 = arith.constant 0 : i32
    %c0_i32_0 = arith.constant 0 : i32
    %c0_i32_1 = arith.constant 0 : i32
    return %c0_i32, %c0_i32_0 : i32, i32
  }
  func.func @transform_5(%arg0: i32) -> (i32, i32) {
    %c0_i32 = arith.constant 0 : i32
    %c0_i32_0 = arith.constant 0 : i32
    %c0_i32_1 = arith.constant 0 : i32
    return %c0_i32, %c0_i32_0 : i32, i32
  }
  func.func @transform_6(%arg0: i32) -> (i32, i32) {
    %c0_i32 = arith.constant 0 : i32
    %c0_i32_0 = arith.constant 0 : i32
    %c0_i32_1 = arith.constant 0 : i32
    return %c0_i32, %c0_i32_0 : i32, i32
  }
  func.func @transform_7(%arg0: i32) -> (i32, i32) {
    %c0_i32 = arith.constant 0 : i32
    %c0_i32_0 = arith.constant 0 : i32
    return %arg0, %c0_i32 : i32, i32
  }
}

</mosaic_0001>

<bundles_post_ra>
// kernel: tpu_custom_call.1
= control target key start
LH: loop header
LB: loop body
LE: loop exit
PB: predicated region body
PF: predicated region fallthrough
CT: control target
= control target key end

     0   :  { %v308_v0 = vmov 0.0   ;;  %vm309_vm0 = vmmov 0   ;;  %vm52_vm1 = vcmask 261120   ;;  %vm218_vm2 = vcmask 523264   ;;  %s398_s1 = inlined_call_operand.vmem [shape: bf16[32,128], index: 1, kind: input, shape index: {}]   ;;  %s399_s3 = inlined_call_operand.vmem [shape: bf16[128,64], index: 3, kind: input, shape index: {}]   ;;  %s400_s0 = inlined_call_operand.vmem [shape: bf16[8,32], index: 0, kind: input, shape index: {}]   ;;  %s401_s2 = inlined_call_operand.vmem [shape: f32[1,128], index: 2, kind: input, shape index: {}]   ;;  %s402_s4 = inlined_call_operand.vmem [shape: f32[1,64], index: 4, kind: input, shape index: {}]   ;;  %s403_s5 = inlined_call_operand.vmem [shape: f32[1,64], index: 5, kind: input, shape index: {}]   ;;  %s404_s6 = inlined_call_operand.<no memory space> [shape: f32[1,1], index: 6, kind: input, shape index: {}]   ;;  %s405_s7 = inlined_call_operand.vmem [shape: f32[8,1], index: 7, kind: output, shape index: {}]  }
   0x1   :  { %264 = vmatprep.subr.bf16.mxu0 %v308_v0  ;;  %v294_v1 = vld [vmem:[%s398_s1 + $0x8] sm:$0xff]   ;;  %268 = vmatprep.mubr.msk.bf16.mxu0 %vm309_vm0, %v308_v0  ;;  %v295_v2 = vld [vmem:[%s398_s1] sm:$0xff]   ;;  %v296_v3 = vld [vmem:[%s399_s3 + $0x38] sm:$0xff]   ;;  %v223_v30 = vstv %s404_s6  ;;  %vm231_vm3 = vcmask 7168  }
   0x2   :  { %272 = vmatprep.subr.bf16.mxu1 %v308_v0  ;;  %288 = vmatprep.mubr.msk.bf16.mxu1 %vm309_vm0, %v308_v0  ;;  %v297_v4 = vld [vmem:[%s399_s3 + $0x30] sm:$0xff]   ;;  %v28_v5 = vld [vmem:[%s400_s0] sm:$0xf]  ;;  %v298_v6 = vld [vmem:[%s399_s3 + $0x28] sm:$0xff]  }
   0x3   :  { %265 = vmatpush3.bf16.msra.mxu0 %v294_v1  ;;  %273 = vmatpush3.bf16.msra.mxu1 %v296_v3  ;;  %v299_v7 = vld [vmem:[%s399_s3 + $0x20] sm:$0xff]   ;;  %v300_v8 = vld [vmem:[%s399_s3 + $0x18] sm:$0xff]   ;;  %v301_v9 = vld [vmem:[%s399_s3 + $0x10] sm:$0xff]  }
   0x4   :  { %266 = vmatprep.subr.bf16.mxu0 %v308_v0  ;;  %274 = vmatprep.subr.bf16.mxu1 %v308_v0  ;;  %v302_v10 = vld [vmem:[%s399_s3 + $0x8] sm:$0xff]   ;;  %v303_v11 = vld [vmem:[%s399_s3] sm:$0xff]  }
   0x5   :  { %v237_v12 = vld [vmem:[%s401_s2] ss:$0 sm:$0xff] }
   0x6   :  { %v241_v20 = vld [vmem:[%s402_s4] ss:$0 sm:$0xff] }
   0x7   :  { %267 = vmatpush3.bf16.msra.mxu0 %v295_v2  ;;  %275 = vmatpush3.bf16.msra.mxu1 %v297_v4  ;;  %v250_v24 = vld [vmem:[%s403_s5] ss:$0 sm:$0xff] }
   0x8   :  { %276 = vmatprep.subr.bf16.mxu1 %v308_v0 }
   0xa   :  { %269 = vmatmul.mubr.msk.bf16.vlgmr.msra.gmra.mxu0 %vm52_vm1, %v28_v5 }
   0xb   :  { %277 = vmatpush3.bf16.msra.mxu1 %v298_v6 }
   0xc   :  { %278 = vmatprep.subr.bf16.mxu1 %v308_v0 }
   0xf   :  { %279 = vmatpush3.bf16.msra.mxu1 %v299_v7 }
  0x10   :  { %280 = vmatprep.subr.bf16.mxu1 %v308_v0 }
  0x13   :  { %281 = vmatpush3.bf16.msra.mxu1 %v300_v8 }
  0x14   :  { %282 = vmatprep.subr.bf16.mxu1 %v308_v0 }
  0x17   :  { %283 = vmatpush3.bf16.msra.mxu1 %v301_v9 }
  0x18   :  { %284 = vmatprep.subr.bf16.mxu1 %v308_v0 }
  0x1b   :  { %285 = vmatpush3.bf16.msra.mxu1 %v302_v10 }
  0x1c   :  { %286 = vmatprep.subr.bf16.mxu1 %v308_v0 }
  0x1f   :  { %287 = vmatpush3.bf16.msra.mxu1 %v303_v11 }
  0xca   :  { %v90_v13 = vpop.f32.mrf.mxu0 }
  0xcb   :  { %v91_v14 = vadd.f32 %v237_v12, %v90_v13 }
  0xcc   :  { %v270_v15 = vpop.f32.mrf.mxu0 }
  0xcd   :  { %v96_v16 = vmax.f32 %v91_v14, 0.0 }
  0xce   :  { %v93_v17 = vpop.f32.mrf.mxu0 }
  0xcf   :  { %v97_v18 = vpack.c.bf16 %v96_v16, %v96_v16 }
  0xd0   :  { %v271_v19 = vpop.f32.mrf.mxu0 }
  0xd1   :  { %289 = vmatmul.mubr.bf16.vlgmr.msra.gmra.mxu1 %v97_v18 }
 0x191   :  { %v203_v21 = vpop.f32.mrf.mxu1 }
 0x192   :  { %v204_v22 = vadd.f32 %v241_v20, %v203_v21 }
 0x193   :  { %v290_v23 = vpop.f32.mrf.mxu1 }
 0x194   :  { %v209_v25 = vmax.f32 %v204_v22, 0.0 }
 0x195   :  { %v206_v26 = vpop.f32.mrf.mxu1 }
 0x196   :  { %v217_v27 = vmul.f32 %v250_v24, %v209_v25 }
 0x197   :  { %v291_v28 = vpop.f32.mrf.mxu1 }
 0x198   :  { %v219_v29 = vsel %vm218_vm2, %v217_v27, 0.0 }
 0x199   :  { %220 = vadd.xlane.f32.xlu0 %v219_v29 }
 0x222   :  { %v221_v31 = vpop.xlane.xlu0 %220 }
 0x223   :  { %v224_v32 = vadd.f32 %v223_v30, %v221_v31 }
 0x225   :  { %v251_v33 = vmul.f32 -1.442695, %v224_v32 }
 0x227   :  { %304 = vpow2.f32 %v251_v33 }
 0x234   :  { %v305_v34 = vpop.eup %304 }
 0x235   :  { %v228_v35 = vadd.f32 1.0, %v305_v34 }
 0x237   :  { %306 = vrcp.f32 %v228_v35 }
 0x244   :  { %v307_v36 = vpop.eup %306 }
 0x245   :  { %232 = vst.msk [vmem:[%s405_s7] sm:$0xff] %vm231_vm3, %v307_v36 }

</bundles_post_ra>
